<compile_context>
chip_gen: v6e
topology: v6e:2x2x1
jax: 0.10.0
libtpu: 0.0.40
codegen_flags: <defaults>
</compile_context>

<pallas_src>
import functools

import jax
import jax.numpy as jnp
from jax import lax
from jax.experimental import pallas as pl
from jax.experimental.pallas import tpu as pltpu

BN_EPS = 1e-5      # torch.nn.BatchNorm3d default
L2_EPS = 1e-12     # torch.nn.functional.normalize default


def _round_up(x, m):
    return ((x + m - 1) // m) * m


def _cdiv(a, b):
    return (a + b - 1) // b


def _vmem_capacity_bytes():
    # Per-TensorCore VMEM: 128 MiB on v5e/v6e, 64 MiB on v7x.  Fall back to
    # the smallest (v7x) value so the tile choice is safe on every generation.
    try:
        return int(pltpu.get_tpu_info().vmem_capacity_bytes)
    except Exception:
        return 64 * 1024 * 1024


def _pick_tile(ms, n, c_in, p, x_itemsize, out_itemsize, tile_m):
    """Pick the voxel-tile width (multiple of 128 lanes) and the VMEM limit."""
    vmem_cap = _vmem_capacity_bytes()
    vmem_limit = (vmem_cap * 3) // 4                  # 48 MiB v7x, 96 MiB v5e/v6e
    block_budget = vmem_limit - 8 * 1024 * 1024       # headroom: weights/internals

    # Double-buffered per-voxel footprint (sublane-padded to 8 rows).
    bytes_per_voxel = 2 * (_round_up(c_in, 8) * x_itemsize +
                           _round_up(p, 8) * out_itemsize)

    tm = min(tile_m, block_budget // bytes_per_voxel)
    tm = max(128, (tm // 128) * 128)
    tm = min(tm, _round_up(ms, 128))                  # never bigger than the problem

    # Megacore (v7x has 2 TensorCores): make sure both get work.
    if n * _cdiv(ms, tm) < 2 and ms > 128:
        tm = max(128, _round_up(_cdiv(ms, 2), 128))
    return tm, vmem_limit


def _projection_head_kernel(x_ref, w1_ref, b1_ref, w2_ref, b2_ref, o_ref):
    # x_ref:  (C_in, TM)   channels on sublanes, voxels on lanes (native dtype)
    # w1_ref: (C_in, C_in) BN-folded conv1 weight (rows = output channels)
    # b1_ref: (C_in, 1)    BN-folded conv1 bias
    # w2_ref: (P, C_in)    conv2 weight
    # b2_ref: (P, 1)       conv2 bias
    # o_ref:  (P, TM)      L2-normalized output tile (lane-dense stores)
    x = x_ref[...].astype(jnp.float32)

    # ---- Conv3d(dim_in, dim_in, 1) with BatchNorm folded in, then ReLU ----
    h = jnp.dot(w1_ref[...], x, preferred_element_type=jnp.float32)
    h = jnp.maximum(h + b1_ref[...], 0.0)

    # ---- Conv3d(dim_in, proj_dim, 1) ---------------------------------------
    y = jnp.dot(w2_ref[...], h, preferred_element_type=jnp.float32)
    y = y + b2_ref[...]

    # ---- F.normalize(p=2, dim=channel): channel axis = sublane axis --------
    sumsq = jnp.sum(y * y, axis=0, keepdims=True)                # (1, TM)
    inv = lax.rsqrt(jnp.maximum(sumsq, L2_EPS * L2_EPS))
    o_ref[...] = (y * inv).astype(o_ref.dtype)


@functools.partial(jax.jit, static_argnames=("tile_m", "out_dtype"))
def projection_head_forward(x, params, tile_m=65536, out_dtype=None):
    """x: (N, C_in, D, H, W) -> (N, proj_dim, D, H, W) (L2-normalized over C)."""
    w1, b1 = params["w1"], params["b1"]
    gamma, beta = params["gamma"], params["beta"]
    mean, var = params["mean"], params["var"]
    w2, b2 = params["w2"], params["b2"]

    n, c_in, d, h, w = x.shape
    p = w2.shape[0]
    ms = d * h * w
    out_dtype = x.dtype if out_dtype is None else out_dtype

    # ---- Fold BatchNorm (inference) into conv1 ------------------------------
    # BN(W1 @ x + b1) = s * (W1 @ x + b1 - mean) + beta,  s = gamma*rsqrt(var+eps)
    s = (gamma * lax.rsqrt(var + BN_EPS)).astype(jnp.float32)
    w1_eff = w1.astype(jnp.float32) * s[:, None]                 # (C_in, C_in)
    b1_eff = ((b1 - mean) * s + beta).astype(jnp.float32)        # (C_in,)
    w2f = w2.astype(jnp.float32)                                 # (P, C_in)
    b2f = b2.astype(jnp.float32)                                 # (P,)

    # ---- Voxel tiling along the lane axis (no padding, no output slice) -----
    x_itemsize = jnp.dtype(x.dtype).itemsize
    out_itemsize = jnp.dtype(out_dtype).itemsize
    tm, vmem_limit = _pick_tile(ms, n, c_in, p, x_itemsize, out_itemsize, tile_m)

    # Pure reshape (no transpose, no dtype cast): channels stay leading.
    x3d = x.reshape(n, c_in, ms)

    grid = (n, _cdiv(ms, tm))
    full = lambda shape: pl.BlockSpec(shape, lambda b, i: (0, 0))

    cost = pl.CostEstimate(
        flops=2 * (c_in * c_in + c_in * p) * n * ms,
        transcendentals=n * ms,
        bytes_accessed=n * ms * (c_in * x_itemsize + p * out_itemsize)
        + 4 * (c_in * c_in + c_in + p * c_in + p),
    )

    out3d = pl.pallas_call(
        _projection_head_kernel,
        out_shape=jax.ShapeDtypeStruct((n, p, ms), out_dtype),
        grid_spec=pltpu.PrefetchScalarGridSpec(
            num_scalar_prefetch=0,
            grid=grid,
            in_specs=[
                pl.BlockSpec((None, c_in, tm), lambda b, i: (b, 0, i)),  # x
                full((c_in, c_in)),   # w1 (BN-folded)
                full((c_in, 1)),      # b1 (BN-folded)
                full((p, c_in)),      # w2
                full((p, 1)),         # b2
            ],
            out_specs=pl.BlockSpec((None, p, tm), lambda b, i: (b, 0, i)),
        ),
        compiler_params=pltpu.CompilerParams(
            dimension_semantics=("parallel", "parallel"),
            vmem_limit_bytes=vmem_limit),
        cost_estimate=cost,
    )(x3d, w1_eff, b1_eff[:, None], w2f, b2f[:, None])

    return out3d.reshape(n, p, d, h, w)     # NCDHW, no transpose needed


def init_params(key, dim_in, proj_dim):
    """Deterministic synthetic parameters matching the module's shapes."""
    k1, k2, k3, k4, k5, k6 = jax.random.split(key, 6)
    return {
        # Conv3d(dim_in, dim_in, 1): weight (dim_in, dim_in, 1, 1, 1) -> squeezed
        "w1": 0.1 * jax.random.normal(k1, (dim_in, dim_in), jnp.float32),
        "b1": 0.1 * jax.random.normal(k2, (dim_in,), jnp.float32),
        # BatchNorm3d(dim_in): inference-mode running stats
        "gamma": 1.0 + 0.05 * jax.random.normal(k3, (dim_in,), jnp.float32),
        "beta": 0.05 * jax.random.normal(k4, (dim_in,), jnp.float32),
        "mean": jnp.zeros((dim_in,), jnp.float32),
        "var": jnp.ones((dim_in,), jnp.float32),
        # Conv3d(dim_in, proj_dim, 1)
        "w2": 0.1 * jax.random.normal(k5, (proj_dim, dim_in), jnp.float32),
        "b2": 0.1 * jax.random.normal(k6, (proj_dim,), jnp.float32),
    }


def _reference_forward(x, params):
    """Pure-JAX reference mirroring the PyTorch module (inference BN)."""
    n, c, d, h, w = x.shape
    x2d = jnp.transpose(x, (0, 2, 3, 4, 1)).reshape(-1, c).astype(jnp.float32)
    hdd = x2d @ params["w1"].T + params["b1"]
    hdd = (hdd - params["mean"]) * jax.lax.rsqrt(params["var"] + BN_EPS)
    hdd = hdd * params["gamma"] + params["beta"]
    hdd = jnp.maximum(hdd, 0.0)
    y = hdd @ params["w2"].T + params["b2"]
    y = y / jnp.maximum(jnp.linalg.norm(y, axis=-1, keepdims=True), L2_EPS)
    y = y.reshape(n, d, h, w, -1)
    return jnp.transpose(y, (0, 4, 1, 2, 3))


if __name__ == "__main__":
    key = jax.random.PRNGKey(0)
    kx, kp = jax.random.split(key)

    N, C_IN, D, H, W = 2, 4, 8, 8, 8          # small NCDHW input
    PROJ_DIM = 32

    x = jax.random.normal(kx, (N, C_IN, D, H, W), jnp.float32)
    params = init_params(kp, C_IN, PROJ_DIM)

    out = projection_head_forward(x, params)
    out = jax.block_until_ready(out)

    ref = _reference_forward(x, params)
    assert out.shape == (N, PROJ_DIM, D, H, W), out.shape
    assert jnp.allclose(out, ref, atol=1e-5, rtol=1e-5), float(
        jnp.max(jnp.abs(out - ref)))

    print("KERNEL_OK")
</pallas_src>

<mosaic_0001>
module attributes {stable_mosaic.version = 11 : i64} {
  func.func @_projection_head_kernel(%arg0: i32, %arg1: i32, %arg2: memref<1x4x512xf32, #tpu.memory_space<vmem>>, %arg3: memref<4x4xf32, #tpu.memory_space<vmem>>, %arg4: memref<4x1xf32, #tpu.memory_space<vmem>>, %arg5: memref<32x4xf32, #tpu.memory_space<vmem>>, %arg6: memref<32x1xf32, #tpu.memory_space<vmem>>, %arg7: memref<1x32x512xf32, #tpu.memory_space<vmem>>) attributes {dimension_semantics = [#tpu.dimension_semantics<parallel>, #tpu.dimension_semantics<parallel>], iteration_bounds = array<i64: 2, 1>, scalar_prefetch = 0 : i64, scratch_operands = 0 : i64, tpu.core_type = #tpu.core_type<tc>, window_params = [{transform_indices = @transform_0, window_bounds = array<i64: 1, 4, 512>}, {pipeline_mode = #tpu.pipeline_mode<synchronous>, transform_indices = @transform_1, window_bounds = array<i64: 4, 4>}, {pipeline_mode = #tpu.pipeline_mode<synchronous>, transform_indices = @transform_2, window_bounds = array<i64: 4, 1>}, {pipeline_mode = #tpu.pipeline_mode<synchronous>, transform_indices = @transform_3, window_bounds = array<i64: 32, 4>}, {pipeline_mode = #tpu.pipeline_mode<synchronous>, transform_indices = @transform_4, window_bounds = array<i64: 32, 1>}, {transform_indices = @transform_5, window_bounds = array<i64: 1, 32, 512>}]} {
    %c0 = arith.constant 0 : index
    %c0_0 = arith.constant 0 : index
    %c0_1 = arith.constant 0 : index
    %0 = vector.load %arg2[%c0, %c0_0, %c0_1] : memref<1x4x512xf32, #tpu.memory_space<vmem>>, vector<1x4x512xf32>
    %1 = vector.shape_cast %0 : vector<1x4x512xf32> to vector<4x512xf32>
    %c0_2 = arith.constant 0 : index
    %c0_3 = arith.constant 0 : index
    %2 = vector.load %arg3[%c0_2, %c0_3] : memref<4x4xf32, #tpu.memory_space<vmem>>, vector<4x4xf32>
    %cst = arith.constant dense<0.000000e+00> : vector<4x512xf32>
    %3 = tpu.matmul %2, %1, %cst {dimension_numbers = #tpu.dot_dimension_numbers<[1], [0], [0], [1], [0, 0, 1, 1], [], []>} : vector<4x4xf32>, vector<4x512xf32>, vector<4x512xf32> -> vector<4x512xf32>
    %c0_4 = arith.constant 0 : index
    %c0_5 = arith.constant 0 : index
    %4 = vector.load %arg4[%c0_4, %c0_5] : memref<4x1xf32, #tpu.memory_space<vmem>>, vector<4x1xf32>
    %5 = vector.broadcast %4 : vector<4x1xf32> to vector<4x512xf32>
    %6 = arith.addf %3, %5 : vector<4x512xf32>
    %cst_6 = arith.constant 0.000000e+00 : f32
    %7 = vector.broadcast %cst_6 : f32 to vector<4x512xf32>
    %8 = arith.maximumf %6, %7 : vector<4x512xf32>
    %c0_7 = arith.constant 0 : index
    %c0_8 = arith.constant 0 : index
    %9 = vector.load %arg5[%c0_7, %c0_8] : memref<32x4xf32, #tpu.memory_space<vmem>>, vector<32x4xf32>
    %cst_9 = arith.constant dense<0.000000e+00> : vector<32x512xf32>
    %10 = tpu.matmul %9, %8, %cst_9 {dimension_numbers = #tpu.dot_dimension_numbers<[1], [0], [0], [1], [0, 0, 1, 1], [], []>} : vector<32x4xf32>, vector<4x512xf32>, vector<32x512xf32> -> vector<32x512xf32>
    %c0_10 = arith.constant 0 : index
    %c0_11 = arith.constant 0 : index
    %11 = vector.load %arg6[%c0_10, %c0_11] : memref<32x1xf32, #tpu.memory_space<vmem>>, vector<32x1xf32>
    %12 = vector.broadcast %11 : vector<32x1xf32> to vector<32x512xf32>
    %13 = arith.addf %10, %12 : vector<32x512xf32>
    %14 = arith.mulf %13, %13 : vector<32x512xf32>
    %cst_12 = arith.constant dense<0.000000e+00> : vector<512xf32>
    %15 = vector.multi_reduction <add>, %14, %cst_12 [0] : vector<32x512xf32> to vector<512xf32>
    %16 = vector.shape_cast %15 : vector<512xf32> to vector<1x512xf32>
    %cst_13 = arith.constant 1.000000e-24 : f32
    %17 = vector.broadcast %cst_13 : f32 to vector<1x512xf32>
    %18 = arith.maximumf %16, %17 : vector<1x512xf32>
    %19 = math.rsqrt %18 : vector<1x512xf32>
    %20 = vector.broadcast %19 : vector<1x512xf32> to vector<32x512xf32>
    %21 = arith.mulf %13, %20 : vector<32x512xf32>
    %c0_14 = arith.constant 0 : index
    %c0_15 = arith.constant 0 : index
    %c0_16 = arith.constant 0 : index
    %22 = vector.load %arg7[%c0_14, %c0_15, %c0_16] : memref<1x32x512xf32, #tpu.memory_space<vmem>>, vector<1x32x512xf32>
    %23 = vector.shape_cast %22 : vector<1x32x512xf32> to vector<32x512xf32>
    %24 = vector.shape_cast %21 : vector<32x512xf32> to vector<1x32x512xf32>
    tpu.vector_store %arg7[%c0_14, %c0_15, %c0_16], %24 {strides = array<i32>} : memref<1x32x512xf32, #tpu.memory_space<vmem>>, vector<1x32x512xf32>,
    return
  }
  func.func @transform_0(%arg0: i32, %arg1: i32) -> (i32, i32, i32) {
    %c0_i32 = arith.constant 0 : i32
    %c0_i32_0 = arith.constant 0 : i32
    return %arg0, %c0_i32, %arg1 : i32, i32, i32
  }
  func.func @transform_1(%arg0: i32, %arg1: i32) -> (i32, i32) {
    %c0_i32 = arith.constant 0 : i32
    %c0_i32_0 = arith.constant 0 : i32
    %c0_i32_1 = arith.constant 0 : i32
    return %c0_i32, %c0_i32_0 : i32, i32
  }
  func.func @transform_2(%arg0: i32, %arg1: i32) -> (i32, i32) {
    %c0_i32 = arith.constant 0 : i32
    %c0_i32_0 = arith.constant 0 : i32
    %c0_i32_1 = arith.constant 0 : i32
    return %c0_i32, %c0_i32_0 : i32, i32
  }
  func.func @transform_3(%arg0: i32, %arg1: i32) -> (i32, i32) {
    %c0_i32 = arith.constant 0 : i32
    %c0_i32_0 = arith.constant 0 : i32
    %c0_i32_1 = arith.constant 0 : i32
    return %c0_i32, %c0_i32_0 : i32, i32
  }
  func.func @transform_4(%arg0: i32, %arg1: i32) -> (i32, i32) {
    %c0_i32 = arith.constant 0 : i32
    %c0_i32_0 = arith.constant 0 : i32
    %c0_i32_1 = arith.constant 0 : i32
    return %c0_i32, %c0_i32_0 : i32, i32
  }
  func.func @transform_5(%arg0: i32, %arg1: i32) -> (i32, i32, i32) {
    %c0_i32 = arith.constant 0 : i32
    %c0_i32_0 = arith.constant 0 : i32
    return %arg0, %c0_i32, %arg1 : i32, i32, i32
  }
}

</mosaic_0001>

<bundles_post_ra>
// kernel: projection_head_forward.1
= control target key start
LH: loop header
LB: loop body
LE: loop exit
PB: predicated region body
PF: predicated region fallthrough
CT: control target
= control target key end

     0   :  { %s970_s18 = smov 0   ;;  %s972_s19 = smov 0   ;;  %s1163_s0 = inlined_call_operand.vmem [shape: f32[2,4,512], index: 0, kind: input, shape index: {}]   ;;  %s1164_s1 = inlined_call_operand.vmem [shape: f32[4,4], index: 1, kind: input, shape index: {}]   ;;  %s1165_s2 = inlined_call_operand.vmem [shape: f32[4,1], index: 2, kind: input, shape index: {}]   ;;  %s1166_s3 = inlined_call_operand.vmem [shape: f32[32,4], index: 3, kind: input, shape index: {}]   ;;  %s1167_s4 = inlined_call_operand.vmem [shape: f32[32,1], index: 4, kind: input, shape index: {}]   ;;  %s1168_s5 = inlined_call_operand.vmem [shape: f32[2,32,512], index: 5, kind: output, shape index: {}]  }
   0x1   :  { %s974_s20 = smov 0  }
   0x2 LB: > { %s27_s21 = sadd.s32 1, %s932_s19  ;;  %p849_p0 = scmp.ge.s32.totalorder %s936_s20, 1  ;;  %s936_s20 = sphi %s974_s20, %s15_s20   ;;  %s932_s19 = sphi %s972_s19, %s1170_s19   ;;  %s928_s18 = sphi %s970_s18, %s1169_s18  }
   0x3   : > { %p29_p1 = scmp.ge.s32.totalorder %s27_s21, 2  ;;  %p208_p2 = scmp.lt.s32.totalorder %s936_s20, 3 }
   0x5   : > { %s1172_s21 = smov (%p29_p1, %s27_s21), 0  ;;  %p209_p3 = pnand %p849_p0, %p208_p2 }
   0x6   : > { %p245_p4 = scmp.lt.s32.totalorder (!%p209_p3), %s928_s18, 1 }
   0x7   : > { %212 = sbr.rel (%p209_p3) target bundleno = 470 (0x1d6), region = 40 }
   0xc   : > { %v938_v0 = vmov 0.0   ;;  %v267_v1 = vld [vmem:[%s1165_s2] sm:$0xf]  ;;  %s1174_s18 = smov (!%p245_p4, %s928_s18), 1  ;;  %v939_v2 = vmov 0   ;;  %vm281_vm0 = vcmask 1043456  }
   0xd   : > { %354 = vmatprep.mubr.f32.mxu0 %v938_v0  ;;  %425 = vmatprep.mubr.f32.mxu1 %v938_v0  ;;  %s874_s24 = sshll.u32 %s1174_s18, 4  ;;  %v440_v3 = vld [vmem:[%s1167_s4] sm:$0xff]  ;;  %vm277_vm1 = vcmask 31744   ;;  %v443_v9 = vld [vmem:[%s1167_s4 + $0x18] sm:$0xff]  ;;  %v441_v10 = vld [vmem:[%s1167_s4 + $0x8] sm:$0xff]  ;;  %s875_s25 = sshll.u32 %s1174_s18, 7 }
   0xe   : > { %902 = vset.pattern.permute.xlu0 %v939_v2  ;;  %903 = vset.pattern.permute.xlu1 %v939_v2  ;;  %s252_s29 = scalar_lea.vmem %s1163_s0, %s874_s24  ;;  %v266_v8 = vld [vmem:[%s1164_s1] sm:$0xf]  ;;  %v442_v11 = vld [vmem:[%s1167_s4 + $0x10] sm:$0xff]  ;;  %v437_v26 = vld [vmem:[%s1166_s3 + $0x8] sm:$0xff]  ;;  %s1120_s28 = scalar_lea.vmem %s1168_s5, %s875_s25 }
   0xf   : > { %270 = vperm.xlu0 %902, %v267_v1   ;;  %v264_v4 = vld [vmem:[%s252_s29] sm:$0xff]  ;;  %v265_v5 = vld [vmem:[%s252_s29 + $0x8] sm:$0xff]  ;;  %451 = vperm.xlu1 %903, %v441_v10   ;;  %v438_v27 = vld [vmem:[%s1166_s3 + $0x10] sm:$0xff] }
  0x10   : > { %v275_v6 = vcombine.high %v264_v4, %v264_v4  ;;  %v276_v7 = vcombine.high %v265_v5, %v265_v5  ;;  %v436_v25 = vld [vmem:[%s1166_s3] sm:$0xff]  ;;  %v439_v28 = vld [vmem:[%s1166_s3 + $0x18] sm:$0xff] }
  0x12   : > { %854 = vmatprep.subr.msk.mxu0 %vm281_vm0, %v275_v6  ;;  %857 = vmatprep.subr.msk.mxu1 %vm281_vm0, %v276_v7 }
  0x13   : > { %446 = vperm.xlu0 %902, %v440_v3   ;;  %855 = vmatpush1.msk.msra.mxu0 %vm281_vm0, %v264_v4 }
  0x14   : > { %858 = vmatpush1.msk.msra.mxu1 %vm281_vm0, %v265_v5  ;;  %856 = vmatmul.mubr.msk.f32.vlgmr.msra.gmra.mxu0 %vm277_vm1, %v266_v8 }
  0x15   : > { %859 = vmatmul.mubr.msk.f32.vlgmr.msra.gmra.mxu1 %vm277_vm1, %v266_v8  ;;  %552 = vmatprep.mubr.f32.mxu0 %v938_v0 }
  0x16   : > { %641 = vmatprep.mubr.f32.mxu1 %v938_v0  ;;  %456 = vperm.xlu1 %903, %v442_v11  }
  0x17   : > { %461 = vperm.xlu0 %902, %v443_v9  }
  0x8a   : > { %v271_v14 = vpop.permute.xlu0 %270  ;;  %v452_v31 = vpop.permute.xlu1 %451 }
  0x8e   : > { %v447_v36 = vpop.permute.xlu0 %446 }
  0x91   : > { %v457_v43 = vpop.permute.xlu1 %456 }
  0x92   : > { %v462_v56 = vpop.permute.xlu0 %461 }
  0xd4   : > { %v356_v12 = vpop.f32.mrf.mxu0 }
  0xd5   : > { %v427_v13 = vpop.f32.mrf.mxu1  ;;  %v357_v15 = vadd.f32 %v356_v12, %v271_v14 }
  0xd6   : > { %v428_v16 = vadd.f32 %v427_v13, %v271_v14  ;;  %v358_v17 = vpop.f32.mrf.mxu0 }
  0xd7   : > { %v429_v18 = vpop.f32.mrf.mxu1  ;;  %v359_v19 = vadd.f32 %v358_v17, %v271_v14  ;;  %v432_v23 = vmax.f32 %v357_v15, 0.0 }
  0xd8   : > { %v430_v20 = vadd.f32 %v429_v18, %v271_v14  ;;  %v434_v24 = vmax.f32 %v428_v16, 0.0 }
  0xd9   : > { %v433_v21 = vmax.f32 %v359_v19, 0.0 }
  0xda   : > { %v435_v22 = vmax.f32 %v430_v20, 0.0 }
  0xdb   : > { %860 = vmatprep.subr.msk.mxu0 %vm281_vm0, %v433_v21 }
  0xdc   : > { %866 = vmatprep.subr.msk.mxu1 %vm281_vm0, %v435_v22  ;;  %861 = vmatpush1.msk.msra.mxu0 %vm281_vm0, %v432_v23 }
  0xdd   : > { %867 = vmatpush1.msk.msra.mxu1 %vm281_vm0, %v434_v24  ;;  %862 = vmatmul.mubr.msk.f32.vlgmr.msra.gmra.mxu0 %vm277_vm1, %v436_v25 }
  0xde   : > { %868 = vmatmul.mubr.msk.f32.vlgmr.msra.gmra.mxu1 %vm277_vm1, %v436_v25  ;;  %558 = vmatprep.mubr.f32.mxu0 %v938_v0 }
  0xdf   : > { %647 = vmatprep.mubr.f32.mxu1 %v938_v0 }
  0xe1   : > { %863 = vmatmul.mubr.msk.f32.gmra.mxu0 %vm277_vm1, %v437_v26 }
  0xe2   : > { %869 = vmatmul.mubr.msk.f32.gmra.mxu1 %vm277_vm1, %v437_v26  ;;  %564 = vmatprep.mubr.f32.mxu0 %v938_v0 }
  0xe3   : > { %653 = vmatprep.mubr.f32.mxu1 %v938_v0 }
  0xe5   : > { %864 = vmatmul.mubr.msk.f32.gmra.mxu0 %vm277_vm1, %v438_v27 }
  0xe6   : > { %870 = vmatmul.mubr.msk.f32.gmra.mxu1 %vm277_vm1, %v438_v27  ;;  %570 = vmatprep.mubr.f32.mxu0 %v938_v0 }
  0xe7   : > { %659 = vmatprep.mubr.f32.mxu1 %v938_v0 }
  0xe9   : > { %865 = vmatmul.mubr.msk.f32.gmra.mxu0 %vm277_vm1, %v439_v28 }
  0xea   : > { %871 = vmatmul.mubr.msk.f32.gmra.mxu1 %vm277_vm1, %v439_v28 }
 0x19d   : > { %v554_v29 = vpop.f32.mrf.mxu0 }
 0x19e   : > { %v643_v30 = vpop.f32.mrf.mxu1  ;;  %v1056_v41 = vadd.f32 %v554_v29, %v447_v36 }
 0x19f   : > { %v556_v32 = vpop.f32.mrf.mxu0  ;;  %v1058_v42 = vadd.f32 %v643_v30, %v447_v36 }
 0x1a0   : > { %v645_v33 = vpop.f32.mrf.mxu1  ;;  %v1068_v50 = vadd.f32 %v556_v32, %v447_v36  ;;  %v666_v57 = vmul.f32 %v1056_v41, %v1056_v41 }
 0x1a1   : > { %v560_v34 = vpop.f32.mrf.mxu0  ;;  %v1070_v51 = vadd.f32 %v645_v33, %v447_v36  ;;  %v668_v58 = vmul.f32 %v1058_v42, %v1058_v42 }
 0x1a2   : > { %v649_v35 = vpop.f32.mrf.mxu1  ;;  %v1052_v37 = vadd.f32 %v560_v34, %v452_v31  ;;  %v667_v7 = vmul.f32 %v1068_v50, %v1068_v50 }
 0x1a3   : > { %v1054_v38 = vadd.f32 %v649_v35, %v452_v31  ;;  %v562_v39 = vpop.f32.mrf.mxu0  ;;  %v669_v8 = vmul.f32 %v1070_v51, %v1070_v51 }
 0x1a4   : > { %v651_v40 = vpop.f32.mrf.mxu1  ;;  %v1060_v44 = vadd.f32 %v562_v39, %v452_v31  ;;  %v670_v48 = vmul.f32 %v1052_v37, %v1052_v37 }
 0x1a5   : > { %v1062_v45 = vadd.f32 %v651_v40, %v452_v31  ;;  %v566_v46 = vpop.f32.mrf.mxu0  ;;  %v672_v49 = vmul.f32 %v1054_v38, %v1054_v38 }
 0x1a6   : > { %v655_v47 = vpop.f32.mrf.mxu1  ;;  %v1072_v52 = vadd.f32 %v566_v46, %v457_v43  ;;  %v671_v61 = vmul.f32 %v1060_v44, %v1060_v44  ;;  %v682_v3 = vadd.f32 %v670_v48, %v666_v57 }
 0x1a7   : > { %v1074_v53 = vadd.f32 %v655_v47, %v457_v43  ;;  %v568_v54 = vpop.f32.mrf.mxu0  ;;  %v673_v62 = vmul.f32 %v1062_v45, %v1062_v45  ;;  %v700_v4 = vadd.f32 %v672_v49, %v668_v58 }
 0x1a8   : > { %v657_v55 = vpop.f32.mrf.mxu1  ;;  %v1080_v59 = vadd.f32 %v568_v54, %v457_v43  ;;  %v674_v63 = vmul.f32 %v1072_v52, %v1072_v52  ;;  %v691_v17 = vadd.f32 %v671_v61, %v667_v7 }
 0x1a9   : > { %v1082_v60 = vadd.f32 %v657_v55, %v457_v43  ;;  %v676_v0 = vmul.f32 %v1074_v53, %v1074_v53  ;;  %v572_v1 = vpop.f32.mrf.mxu0  ;;  %v709_v18 = vadd.f32 %v673_v62, %v669_v8 }
 0x1aa   : > { %v661_v2 = vpop.f32.mrf.mxu1  ;;  %v1092_v5 = vadd.f32 %v572_v1, %v462_v56  ;;  %v675_v9 = vmul.f32 %v1080_v59, %v1080_v59  ;;  %v683_v13 = vadd.f32 %v682_v3, %v674_v63 }
 0x1ab   : > { %v1094_v6 = vadd.f32 %v661_v2, %v462_v56  ;;  %v677_v10 = vmul.f32 %v1082_v60, %v1082_v60  ;;  %v574_v11 = vpop.f32.mrf.mxu0  ;;  %v701_v14 = vadd.f32 %v700_v4, %v676_v0 }
 0x1ac   : > { %v663_v12 = vpop.f32.mrf.mxu1  ;;  %v678_v15 = vmul.f32 %v1092_v5, %v1092_v5  ;;  %v1108_v19 = vadd.f32 %v574_v11, %v462_v56  ;;  %v692_v23 = vadd.f32 %v691_v17, %v675_v9 }
 0x1ad   : > { %v680_v16 = vmul.f32 %v1094_v6, %v1094_v6  ;;  %v1110_v20 = vadd.f32 %v663_v12, %v462_v56  ;;  %v710_v24 = vadd.f32 %v709_v18, %v677_v10 }
 0x1ae   : > { %v684_v21 = vadd.f32 %v683_v13, %v678_v15  ;;  %v679_v25 = vmul.f32 %v1108_v19, %v1108_v19 }
 0x1af   : > { %v702_v22 = vadd.f32 %v701_v14, %v680_v16  ;;  %v681_v26 = vmul.f32 %v1110_v20, %v1110_v20 }
 0x1b0   : > { %v685_v27 = vrot.slane %v684_v21, 4  ;;  %v693_v29 = vadd.f32 %v692_v23, %v679_v25 }
 0x1b1   : > { %v703_v28 = vrot.slane %v702_v22, 4  ;;  %v711_v30 = vadd.f32 %v710_v24, %v681_v26 }
 0x1b2   : > { %v686_v31 = vadd.f32 %v685_v27, %v684_v21  ;;  %v694_v33 = vrot.slane %v693_v29, 4 }
 0x1b3   : > { %v704_v32 = vadd.f32 %v703_v28, %v702_v22  ;;  %v712_v34 = vrot.slane %v711_v30, 4 }
 0x1b4   : > { %v687_v35 = vrot.slane %v686_v31, 2  ;;  %v695_v39 = vadd.f32 %v694_v33, %v693_v29 }
 0x1b5   : > { %v705_v36 = vrot.slane %v704_v32, 2  ;;  %v713_v40 = vadd.f32 %v712_v34, %v711_v30 }
 0x1b6   : > { %v688_v43 = vadd.f32 %v687_v35, %v686_v31  ;;  %v696_v47 = vrot.slane %v695_v39, 2 }
 0x1b7   : > { %v706_v46 = vadd.f32 %v705_v36, %v704_v32  ;;  %v714_v48 = vrot.slane %v713_v40, 2 }
 0x1b8   : > { %v689_v49 = vrot.slane %v688_v43, 1  ;;  %v697_v55 = vadd.f32 %v696_v47, %v695_v39 }
 0x1b9   : > { %v707_v54 = vrot.slane %v706_v46, 1  ;;  %v715_v56 = vadd.f32 %v714_v48, %v713_v40 }
 0x1ba   : > { %v690_v57 = vadd.f32 %v689_v49, %v688_v43  ;;  %v698_v61 = vrot.slane %v697_v55, 1 }
 0x1bb   : > { %v708_v58 = vadd.f32 %v707_v54, %v706_v46  ;;  %v716_v62 = vrot.slane %v715_v56, 1 }
 0x1bc   : > { %v718_v63 = vmax.f32 %v690_v57, 1e-24  ;;  %v699_v1 = vadd.f32 %v698_v61, %v697_v55 }
 0x1bd   : > { %v720_v0 = vmax.f32 %v708_v58, 1e-24  ;;  %v717_v2 = vadd.f32 %v716_v62, %v715_v56 }
 0x1be   : > { %906 = vrsqrt.f32 %v718_v63  ;;  %v719_v3 = vmax.f32 %v699_v1, 1e-24 }
 0x1bf   : > { %908 = vrsqrt.f32 %v720_v0  ;;  %v721_v4 = vmax.f32 %v717_v2, 1e-24 }
 0x1c0   : > { %910 = vrsqrt.f32 %v719_v3 }
 0x1c1   : > { %912 = vrsqrt.f32 %v721_v4 }
 0x1cb   : > { %v907_v7 = vpop.eup %906 }
 0x1cc   : > { %v909_v8 = vpop.eup %908  ;;  %v726_v9 = vmul.f32 %v907_v7, %v1056_v41  ;;  %v730_v10 = vmul.f32 %v907_v7, %v1052_v37  ;;  %v734_v11 = vmul.f32 %v907_v7, %v1072_v52  ;;  %v738_v12 = vmul.f32 %v907_v7, %v1092_v5 }
 0x1cd   : > { %v728_v13 = vmul.f32 %v909_v8, %v1058_v42  ;;  %v732_v14 = vmul.f32 %v909_v8, %v1054_v38  ;;  %v736_v15 = vmul.f32 %v909_v8, %v1074_v53  ;;  %v740_v16 = vmul.f32 %v909_v8, %v1094_v6  ;;  %v911_v17 = vpop.eup %910 }
 0x1ce   : > { %742 = vst [vmem:[%s1120_s28] sm:$0xff] %v726_v9  ;;  %746 = vst [vmem:[%s1120_s28 + $0x20] sm:$0xff] %v730_v10  ;;  %v913_v37 = vpop.eup %912  ;;  %v727_v38 = vmul.f32 %v911_v17, %v1068_v50  ;;  %v731_v41 = vmul.f32 %v911_v17, %v1060_v44  ;;  %v735_v42 = vmul.f32 %v911_v17, %v1080_v59 }
 0x1cf   : > { %750 = vst [vmem:[%s1120_s28 + $0x40] sm:$0xff] %v734_v11  ;;  %754 = vst [vmem:[%s1120_s28 + $0x60] sm:$0xff] %v738_v12  ;;  %v739_v52 = vmul.f32 %v911_v17, %v1108_v19  ;;  %v729_v53 = vmul.f32 %v913_v37, %v1070_v51  ;;  %v733_v5 = vmul.f32 %v913_v37, %v1062_v45 }
 0x1d0   : > { %744 = vst [vmem:[%s1120_s28 + $0x10] sm:$0xff] %v728_v13  ;;  %748 = vst [vmem:[%s1120_s28 + $0x30] sm:$0xff] %v732_v14  ;;  %v737_v6 = vmul.f32 %v913_v37, %v1082_v60  ;;  %v741_v18 = vmul.f32 %v913_v37, %v1110_v20 }
 0x1d1   : > { %752 = vst [vmem:[%s1120_s28 + $0x50] sm:$0xff] %v736_v15  ;;  %756 = vst [vmem:[%s1120_s28 + $0x70] sm:$0xff] %v740_v16 }
 0x1d2   : > { %743 = vst [vmem:[%s1120_s28 + $0x8] sm:$0xff] %v727_v38  ;;  %747 = vst [vmem:[%s1120_s28 + $0x28] sm:$0xff] %v731_v41 }
 0x1d3   : > { %751 = vst [vmem:[%s1120_s28 + $0x48] sm:$0xff] %v735_v42  ;;  %755 = vst [vmem:[%s1120_s28 + $0x68] sm:$0xff] %v739_v52 }
 0x1d4   : > { %745 = vst [vmem:[%s1120_s28 + $0x18] sm:$0xff] %v729_v53  ;;  %749 = vst [vmem:[%s1120_s28 + $0x38] sm:$0xff] %v733_v5 }
 0x1d5   : > { %753 = vst [vmem:[%s1120_s28 + $0x58] sm:$0xff] %v737_v6  ;;  %757 = vst [vmem:[%s1120_s28 + $0x78] sm:$0xff] %v741_v18 }
 0x1d6 PF: > { %s15_s20 = sadd.s32 1, %s936_s20   ;;  %s1169_s18 = smov %s932_s19 }
 0x1d7   : > { %p12_p5 = scmp.ge.s32.totalorder %s15_s20, 4   ;;  %s1170_s19 = smov %s1172_s21 }
 0x1d9   :  { %14 = sbr.rel (!%p12_p5) target bundleno = 2 (0x2), region = 70 }

</bundles_post_ra>
